<compile_context>
chip_gen: v6e
topology: v6e:2x2x1
jax: 0.10.0
libtpu: 0.0.40
codegen_flags: <defaults>
</compile_context>

<pallas_src>
import jax
import jax.numpy as jnp
import numpy as np
from jax import lax
from jax.experimental import pallas as pl
from jax.experimental.pallas import tpu as pltpu

# Problem sizes fixed by the torch-mlir annotation.
N, CI, H, W = 1, 2, 8, 8            # input_vec : [1, 2, 8, 8]
CO, OH, OW = 2, 4, 4                # grad_out  : [1, 2, 4, 4]
K = 3                               # weight    : [2, 2, 3, 3]
STRIDE, PAD = 2, 1

HW = H * W                          # 64 input spatial positions (lane axis)
S = OH * OW                         # 16 grad_out spatial positions
T = K * K                           # 9  kernel taps
RT = T * CO                         # 18 gcols rows, (tap, out-channel) order
CC = T * S                          # 144 contraction dim of the gcols matmul

f32 = jnp.float32

# Packed-constant row offsets (multiples of 8 so in-kernel slices need no
# sublane shifts).
_MASK_R0 = 0                        # rows  0..17 : MASK (RT, CC)
_L_R0 = 24                          # rows 24..39 : L    (S,  CC)
_REPC_R0 = 40                       # rows 40..57 : REPC (RT, CO) in lanes 0..1
_CPACK_ROWS = 64

# Output-slab layout (8-aligned row offsets -> no sublane rotates on store).
_GI_R0, _GW_R0 = 0, 8
_SLAB_ROWS, _SLAB_LANES = 32, 128


def _build_constants():
    """Compile-time geometry for the stride-2 / pad-1 / 3x3 backward conv."""
    # G[(u, s), hw] = 1 iff grad_out pixel s=(oh,ow) reaches input pixel
    # hw=(h,w) through tap u=(a,b): h == 2*oh + a - 1 and w == 2*ow + b - 1.
    # Zero padding and the transposed-conv "flip" are absorbed here.
    g = np.zeros((CC, HW), np.float32)
    for u in range(T):
        a, b = divmod(u, K)
        for s in range(S):
            oh, ow = divmod(s, OW)
            h = STRIDE * oh + a - PAD
            w = STRIDE * ow + b - PAD
            if 0 <= h < H and 0 <= w < W:
                g[u * S + s, h * W + w] = 1.0

    cpack = np.zeros((_CPACK_ROWS, CC), np.float32)
    r = np.arange(RT)[:, None]
    c = np.arange(CC)[None, :]
    # MASK[r, c] = 1 iff tap(row) == tap(column):  r // CO == c // S.
    cpack[_MASK_R0:_MASK_R0 + RT, :] = (r // CO == c // S).astype(np.float32)
    # L[s, c] = 1 iff c % S == s  (lane replication of go across the T blocks).
    cpack[_L_R0:_L_R0 + S, :] = np.tile(np.eye(S, dtype=np.float32), (1, T))
    # REPC[r, o] = 1 iff r % CO == o  (sublane replication of go to (t,o) rows).
    cpack[_REPC_R0:_REPC_R0 + RT, :CO] = np.tile(
        np.eye(CO, dtype=np.float32), (T, 1))
    return g, cpack


_G_NP, _CPACK_NP = _build_constants()


def _conv_bwd_kernel(go_ref, xt_ref, wp_ref, cpack_ref, g_ref, out_ref):
    """go:(CO,S)  xT:(HW,CI)  wP:(CI,RT)  cpack:(64,CC)  g:(CC,HW) -> slab."""
    go = go_ref[...]                                             # (CO, S)

    # Block-diagonal replicated-grad_out LHS, built on the MXU (no Python
    # scatter loops, no scratch): lhs[(t,o), (u,s)] = go[o, s] * [t == u].
    repc = cpack_ref[_REPC_R0:_REPC_R0 + RT, 0:CO]               # (RT, CO)
    lmat = cpack_ref[_L_R0:_L_R0 + S, :]                         # (S,  CC)
    mask = cpack_ref[_MASK_R0:_MASK_R0 + RT, :]                  # (RT, CC)
    rep = jnp.dot(repc, go, preferred_element_type=f32)          # (RT, S)
    lhs = jnp.dot(rep, lmat, preferred_element_type=f32) * mask  # (RT, CC)

    # gcols[(t,o), hw]: im2col of the stride-dilated / zero-padded grad_out,
    # emitted directly in (RT, HW) layout and shared by both weight/input grads.
    gcols = jnp.dot(lhs, g_ref[...], preferred_element_type=f32)  # (RT, HW)

    # grad_input: one dot against the wrapper-pre-permuted weight.
    gi = jnp.dot(wp_ref[...], gcols, preferred_element_type=f32)  # (CI, HW)
    # grad_weight: NN dot against the pre-transposed input (no XLU transpose).
    gw = jnp.dot(gcols, xt_ref[...], preferred_element_type=f32)  # (RT, CI)
    # grad_bias: plain row-sum of grad_out.
    gb = jnp.sum(go, axis=1, keepdims=True)                       # (CO, 1)

    # Single lane-aligned output slab; all blocks stored at 8-aligned sublane
    # offsets and lane offset 0 (bias sits at lane HW -> one cheap rotate).
    out_ref[...] = jnp.zeros((_SLAB_ROWS, _SLAB_LANES), f32)
    out_ref[_GI_R0:_GI_R0 + CI, 0:HW] = gi
    out_ref[_GI_R0:_GI_R0 + CI, HW:HW + 1] = gb
    out_ref[_GW_R0:_GW_R0 + RT, 0:CI] = gw


@jax.jit
def convolution_backward_2d_strided(grad_out, input_vec, weight):
    """aten.convolution_backward(stride=[2,2], padding=[1,1], dilation=[1,1],
    groups=1, output_mask=[True, True, True]) for the fixed test shapes."""
    grad_out = grad_out.astype(f32)
    input_vec = input_vec.astype(f32)
    weight = weight.astype(f32)

    # Wrapper prep is metadata-only or tiny (<=128 elements) permutes.
    go2 = grad_out.reshape(CO, S)                        # (2, 16)
    xt = input_vec.reshape(CI, HW).T                     # (64, 2)
    wp = weight.transpose(1, 2, 3, 0).reshape(CI, RT)    # (2, 18): [i, t*CO+o]

    g_c = jnp.asarray(_G_NP)                             # baked constants
    cpack_c = jnp.asarray(_CPACK_NP)

    # TODO(synk): for N > 1 (or many instances) stack batches into the matmul
    # M dimension / add a "parallel" grid axis so v7x's second TensorCore gets
    # work; N == 1 here so a single ungridded call wins.
    slab = pl.pallas_call(
        _conv_bwd_kernel,
        out_shape=jax.ShapeDtypeStruct((_SLAB_ROWS, _SLAB_LANES), f32),
        in_specs=[pl.BlockSpec(memory_space=pltpu.MemorySpace.VMEM)] * 5,
        out_specs=pl.BlockSpec(memory_space=pltpu.MemorySpace.VMEM),
    )(go2, xt, wp, cpack_c, g_c)

    # Output-side extraction only (tiny slices / permutes).
    grad_input = slab[_GI_R0:_GI_R0 + CI, 0:HW].reshape(N, CI, H, W)
    grad_bias = slab[_GI_R0:_GI_R0 + CI, HW]                     # (CO,)
    gw = slab[_GW_R0:_GW_R0 + RT, 0:CI]                          # (RT, CI)
    grad_weight = gw.reshape(K, K, CO, CI).transpose(2, 3, 0, 1)
    # NOTE: bias_sizes=[4] in the torch test is ignored by the aten
    # decomposition; grad_bias is the (N, OH, OW) sum of grad_out -> [CO].
    return grad_input, grad_weight, grad_bias


if __name__ == "__main__":
    key = jax.random.PRNGKey(0)
    k1, k2, k3 = jax.random.split(key, 3)
    grad_out = jax.random.normal(k1, (N, CO, OH, OW), dtype=f32)
    input_vec = jax.random.normal(k2, (N, CI, H, W), dtype=f32)
    weight = jax.random.normal(k3, (CO, CI, K, K), dtype=f32)

    gi, gw, gb = jax.block_until_ready(
        convolution_backward_2d_strided(grad_out, input_vec, weight))

    # Reference via JAX autodiff of the forward convolution.
    def ref_fwd(x, w):
        return lax.conv_general_dilated(
            x, w, window_strides=(STRIDE, STRIDE),
            padding=((PAD, PAD), (PAD, PAD)),
            dimension_numbers=("NCHW", "OIHW", "NCHW"))

    _, vjp_fn = jax.vjp(ref_fwd, input_vec, weight)
    gi_ref, gw_ref = vjp_fn(grad_out)
    gb_ref = grad_out.sum(axis=(0, 2, 3))

    np.testing.assert_allclose(np.asarray(gi), np.asarray(gi_ref),
                               rtol=1e-4, atol=1e-5)
    np.testing.assert_allclose(np.asarray(gw), np.asarray(gw_ref),
                               rtol=1e-4, atol=1e-5)
    np.testing.assert_allclose(np.asarray(gb), np.asarray(gb_ref),
                               rtol=1e-4, atol=1e-5)

    print("KERNEL_OK")
</pallas_src>

<mosaic_0001>
module attributes {stable_mosaic.version = 11 : i64} {
  func.func @_conv_bwd_kernel(%arg0: memref<2x16xf32, #tpu.memory_space<vmem>>, %arg1: memref<64x2xf32, #tpu.memory_space<vmem>>, %arg2: memref<2x18xf32, #tpu.memory_space<vmem>>, %arg3: memref<64x144xf32, #tpu.memory_space<vmem>>, %arg4: memref<144x64xf32, #tpu.memory_space<vmem>>, %arg5: memref<32x128xf32, #tpu.memory_space<vmem>>) attributes {dimension_semantics = [], scalar_prefetch = 0 : i64, scratch_operands = 0 : i64, tpu.core_type = #tpu.core_type<tc>} {
    %c0 = arith.constant 0 : index
    %c0_0 = arith.constant 0 : index
    %0 = vector.load %arg0[%c0, %c0_0] : memref<2x16xf32, #tpu.memory_space<vmem>>, vector<2x16xf32>
    %c40 = arith.constant 40 : index
    %c0_1 = arith.constant 0 : index
    %1 = vector.load %arg3[%c40, %c0_1] : memref<64x144xf32, #tpu.memory_space<vmem>>, vector<18x2xf32>
    %c24 = arith.constant 24 : index
    %c0_2 = arith.constant 0 : index
    %2 = vector.load %arg3[%c24, %c0_2] : memref<64x144xf32, #tpu.memory_space<vmem>>, vector<16x144xf32>
    %c0_3 = arith.constant 0 : index
    %c0_4 = arith.constant 0 : index
    %3 = vector.load %arg3[%c0_3, %c0_4] : memref<64x144xf32, #tpu.memory_space<vmem>>, vector<18x144xf32>
    %cst = arith.constant dense<0.000000e+00> : vector<18x16xf32>
    %4 = tpu.matmul %1, %0, %cst {dimension_numbers = #tpu.dot_dimension_numbers<[1], [0], [0], [1], [0, 0, 1, 1], [], []>} : vector<18x2xf32>, vector<2x16xf32>, vector<18x16xf32> -> vector<18x16xf32>
    %cst_5 = arith.constant dense<0.000000e+00> : vector<18x144xf32>
    %5 = tpu.matmul %4, %2, %cst_5 {dimension_numbers = #tpu.dot_dimension_numbers<[1], [0], [0], [1], [0, 0, 1, 1], [], []>} : vector<18x16xf32>, vector<16x144xf32>, vector<18x144xf32> -> vector<18x144xf32>
    %6 = arith.mulf %5, %3 : vector<18x144xf32>
    %c0_6 = arith.constant 0 : index
    %c0_7 = arith.constant 0 : index
    %7 = vector.load %arg4[%c0_6, %c0_7] : memref<144x64xf32, #tpu.memory_space<vmem>>, vector<144x64xf32>
    %cst_8 = arith.constant dense<0.000000e+00> : vector<18x64xf32>
    %8 = tpu.matmul %6, %7, %cst_8 {dimension_numbers = #tpu.dot_dimension_numbers<[1], [0], [0], [1], [0, 0, 1, 1], [], []>} : vector<18x144xf32>, vector<144x64xf32>, vector<18x64xf32> -> vector<18x64xf32>
    %c0_9 = arith.constant 0 : index
    %c0_10 = arith.constant 0 : index
    %9 = vector.load %arg2[%c0_9, %c0_10] : memref<2x18xf32, #tpu.memory_space<vmem>>, vector<2x18xf32>
    %cst_11 = arith.constant dense<0.000000e+00> : vector<2x64xf32>
    %10 = tpu.matmul %9, %8, %cst_11 {dimension_numbers = #tpu.dot_dimension_numbers<[1], [0], [0], [1], [0, 0, 1, 1], [], []>} : vector<2x18xf32>, vector<18x64xf32>, vector<2x64xf32> -> vector<2x64xf32>
    %c0_12 = arith.constant 0 : index
    %c0_13 = arith.constant 0 : index
    %11 = vector.load %arg1[%c0_12, %c0_13] : memref<64x2xf32, #tpu.memory_space<vmem>>, vector<64x2xf32>
    %cst_14 = arith.constant dense<0.000000e+00> : vector<18x2xf32>
    %12 = tpu.matmul %8, %11, %cst_14 {dimension_numbers = #tpu.dot_dimension_numbers<[1], [0], [0], [1], [0, 0, 1, 1], [], []>} : vector<18x64xf32>, vector<64x2xf32>, vector<18x2xf32> -> vector<18x2xf32>
    %cst_15 = arith.constant dense<0.000000e+00> : vector<2xf32>
    %13 = vector.multi_reduction <add>, %0, %cst_15 [1] : vector<2x16xf32> to vector<2xf32>
    %14 = vector.shape_cast %13 : vector<2xf32> to vector<2x1xf32>
    %cst_16 = arith.constant 0.000000e+00 : f32
    %15 = vector.broadcast %cst_16 : f32 to vector<32x128xf32>
    %c0_17 = arith.constant 0 : index
    %c0_18 = arith.constant 0 : index
    %16 = vector.load %arg5[%c0_17, %c0_18] : memref<32x128xf32, #tpu.memory_space<vmem>>, vector<32x128xf32>
    tpu.vector_store %arg5[%c0_17, %c0_18], %15 {strides = array<i32>} : memref<32x128xf32, #tpu.memory_space<vmem>>, vector<32x128xf32>,
    %c0_19 = arith.constant 0 : index
    %c0_20 = arith.constant 0 : index
    %17 = vector.load %arg5[%c0_19, %c0_20] : memref<32x128xf32, #tpu.memory_space<vmem>>, vector<2x64xf32>
    tpu.vector_store %arg5[%c0_19, %c0_20], %10 {strides = array<i32>} : memref<32x128xf32, #tpu.memory_space<vmem>>, vector<2x64xf32>,
    %c0_21 = arith.constant 0 : index
    %c64 = arith.constant 64 : index
    %18 = vector.load %arg5[%c0_21, %c64] : memref<32x128xf32, #tpu.memory_space<vmem>>, vector<2x1xf32>
    tpu.vector_store %arg5[%c0_21, %c64], %14 {strides = array<i32>} : memref<32x128xf32, #tpu.memory_space<vmem>>, vector<2x1xf32>,
    %c8 = arith.constant 8 : index
    %c0_22 = arith.constant 0 : index
    %19 = vector.load %arg5[%c8, %c0_22] : memref<32x128xf32, #tpu.memory_space<vmem>>, vector<18x2xf32>
    tpu.vector_store %arg5[%c8, %c0_22], %12 {strides = array<i32>} : memref<32x128xf32, #tpu.memory_space<vmem>>, vector<18x2xf32>,
    return
  }
}

</mosaic_0001>

<bundles_post_ra>
// kernel: convolution_backward_2d_strided.1
= control target key start
LH: loop header
LB: loop body
LE: loop exit
PB: predicated region body
PF: predicated region fallthrough
CT: control target
= control target key end

     0   :  { %10 = vsyncpa [#allocation3], 0  ;;  %s650_s18 = smov [#allocation2]   ;;  %s867_s0 = inlined_call_operand.vmem [shape: f32[2,16], index: 0, kind: input, shape index: {}]   ;;  %s868_s1 = inlined_call_operand.vmem [shape: f32[64,2], index: 1, kind: input, shape index: {}]   ;;  %s869_s2 = inlined_call_operand.vmem [shape: f32[2,18], index: 2, kind: input, shape index: {}]   ;;  %s870_s3 = inlined_call_operand.hbm [shape: f32[64,144], index: 3, kind: input, shape index: {}]   ;;  %s871_s4 = inlined_call_operand.vmem [shape: f32[144,64], index: 4, kind: input, shape index: {}]   ;;  %s872_s5 = inlined_call_operand.vmem [shape: f32[32,128], index: 5, kind: output, shape index: {}]  }
   0x1   :  { %s22_s19 = sshll.u32 %s650_s18, 4  ;;  %s23_s19 = int_to_ptr.vmem [resolvable:$true] %s22_s19 }
   0x2   :  { %s636_s20 = scalar_lea.vmem %s23_s19, 2048  ;;  %p641_p1 = scmp.lt.s32.totalorder %s23_s19, %s23_s19 }
   0x3   :  { %p637_p0 = scmp.ne.s32.totalorder %s23_s19, %s636_s20  ;;  %p642_p2 = scmp.lt.s32.totalorder %s636_s20, %s636_s20 }
   0x5   :  { %p643_p3 = por %p642_p2, %p641_p1 }
   0x7   :  { %p644_p4 = pnand %p643_p3, %p637_p0 }
   0x9   :  { %647 = shalt.err (!%p644_p4)
}
   0xa   :  { %s651_s21 = smov 256   ;;  %s652_s22 = smov 16  }
   0xb   :  { %28 = dma.hbm_to_vmem [thread:$0]  %s870_s3, 2048, %s23_s19, [#allocation3], %s651_s21, %s651_s21, %s652_s22  }
   0xc   :  { %648 = dma.done.wait [#allocation3], 2048  }
   0xd   :  { %649 = vsyncadd [#allocation3], 4294965248  ;;  %v653_v0 = vmov 0.0   ;;  %vm654_vm0 = vmmov 0   ;;  %vm58_vm1 = vcmask 1041408   ;;  %vm48_vm2 = vcmask 15360  }
   0xe   :  { %578 = vmatprep.subr.mxu0 %v653_v0  ;;  %527 = vst [vmem:[%s872_s5] sm:$0xff] %v653_v0  ;;  %528 = vst [vmem:[%s872_s5 + $0x8] sm:$0xff] %v653_v0  ;;  %580 = vmatprep.mubr.msk.f32.mxu0 %vm654_vm0, %v653_v0  ;;  %v711_v1 = vld [vmem:[%s867_s0] sm:$0x3]  ;;  %v35_v2 = vld [vmem:[#allocation2 + $0x50] sm:$0xff]  ;;  %vm142_vm3 = vcmask 130048   ;;  %vm523_vm4 = vcmask 123904  }
   0xf   :  { %529 = vst [vmem:[%s872_s5 + $0x10] sm:$0xff] %v653_v0  ;;  %530 = vst [vmem:[%s872_s5 + $0x18] sm:$0xff] %v653_v0  ;;  %216 = vmatprep.mubr.f32.mxu1 %v653_v0  ;;  %579 = vmatpush3.msk.msra.mxu0 %vm58_vm1, %v711_v1  ;;  %v41_v3 = vld [vmem:[#allocation2 + $0x48] sm:$0xff]  ;;  %v40_v4 = vld [vmem:[#allocation2 + $0x40] sm:$0xff]  ;;  %v524_v51 = vsel %vm523_vm4, %v711_v1, 0.0  ;;  %vm349_vm5 = vcmask 146432  }
  0x10   :  { %581 = vmatmul.mubr.msk.f32.vlgmr.msra.gmra.mxu0 %vm48_vm2, %v35_v2  ;;  %180 = vmatprep.subr.mxu1 %v41_v3  ;;  %v39_v5 = vld [vmem:[#allocation2 + $0x38] sm:$0xff]  ;;  %v36_v6 = vld [vmem:[#allocation2 + $0x60] sm:$0xff]  ;;  %v37_v7 = vld [vmem:[#allocation2 + $0x70] sm:$0x3]  ;;  %vm434_vm6 = vcmask 523264   ;;  %vm531_vm7 = vcmask 517120  }
  0x11   :  { %583 = vmatprep.mubr.msk.f32.mxu0 %vm654_vm0, %v653_v0  ;;  %181 = vmatpush1.msra.mxu1 %v40_v4  ;;  %v38_v8 = vld [vmem:[#allocation2 + $0x30] sm:$0xff]  ;;  %v256_v9 = vld [vmem:[%s871_s4 + $0x78] sm:$0xff]  ;;  %v254_v11 = vld [vmem:[%s871_s4 + $0x68] sm:$0xff]  ;;  %vm533_vm8 = vcmask 525824   ;;  %vm537_vm9 = vcmask 9216  }
  0x12   :  { %182 = vmatprep.subr.mxu1 %v39_v5  ;;  %268 = vmatprep.subr.mxu0 %v653_v0  ;;  %v255_v10 = vld [vmem:[%s871_s4 + $0x70] sm:$0xff]  ;;  %v253_v12 = vld [vmem:[%s871_s4 + $0x60] sm:$0xff]  ;;  %v252_v13 = vld [vmem:[%s871_s4 + $0x58] sm:$0xff] }
  0x13   :  { %183 = vmatpush1.msra.mxu1 %v38_v8  ;;  %269 = vmatpush1.msra.mxu0 %v256_v9  ;;  %v251_v14 = vld [vmem:[%s871_s4 + $0x50] sm:$0xff]  ;;  %v250_v15 = vld [vmem:[%s871_s4 + $0x48] sm:$0xff]  ;;  %v249_v16 = vld [vmem:[%s871_s4 + $0x40] sm:$0xff] }
  0x14   :  { %584 = vmatmul.mubr.msk.f32.gmra.mxu0 %vm48_vm2, %v36_v6  ;;  %589 = vmatprep.subr.mxu1 %v653_v0  ;;  %v248_v17 = vld [vmem:[%s871_s4 + $0x38] sm:$0xff]  ;;  %v247_v18 = vld [vmem:[%s871_s4 + $0x30] sm:$0xff]  ;;  %v246_v19 = vld [vmem:[%s871_s4 + $0x28] sm:$0xff] }
  0x15   :  { %586 = vmatprep.mubr.msk.f32.mxu0 %vm654_vm0, %v653_v0  ;;  %270 = vmatprep.subr.mxu0 %v653_v0  ;;  %v245_v20 = vld [vmem:[%s871_s4 + $0x20] sm:$0xff]  ;;  %v244_v21 = vld [vmem:[%s871_s4 + $0x18] sm:$0xff]  ;;  %v243_v22 = vld [vmem:[%s871_s4 + $0x10] sm:$0xff] }
  0x16   :  { %271 = vmatpush1.msra.mxu0 %v255_v10  ;;  %v242_v23 = vld [vmem:[%s871_s4 + $0x8] sm:$0xff]  ;;  %v241_v30 = vld [vmem:[%s871_s4] sm:$0xff]  ;;  %v45_v40 = vld [vmem:[#allocation2 + $0x18] sm:$0xff]  ;;  %525 = vadd.xlane.f32.xlu0 %v524_v51 }
  0x17   :  { %272 = vmatprep.subr.mxu0 %v653_v0  ;;  %v258_v31 = vld [vmem:[%s871_s4 + $0x88] sm:$0xff]  ;;  %v257_v32 = vld [vmem:[%s871_s4 + $0x80] sm:$0xff]  ;;  %v44_v41 = vld [vmem:[#allocation2 + $0x10] sm:$0xff] }
  0x18   :  { %587 = vmatmul.mubr.msk.f32.gmra.mxu0 %vm48_vm2, %v37_v7  ;;  %v43_v34 = vld [vmem:[#allocation2 + $0x8] sm:$0xff]  ;;  %v42_v35 = vld [vmem:[#allocation2] sm:$0xff]  ;;  %v433_v59 = vld [vmem:[%s868_s1 + $0x38] sm:$0xff] }
  0x19   :  { %273 = vmatpush1.msra.mxu0 %v254_v11  ;;  %v47_v46 = vld [vmem:[#allocation2 + $0x28] sm:$0x3]  ;;  %v46_v47 = vld [vmem:[#allocation2 + $0x20] sm:$0x3]  ;;  %v432_v60 = vld [vmem:[%s868_s1 + $0x30] sm:$0xff] }
  0x1a   :  { %274 = vmatprep.subr.mxu0 %v653_v0  ;;  %v348_v58 = vld [vmem:[%s869_s2] sm:$0x3]  ;;  %v431_v61 = vld [vmem:[%s868_s1 + $0x28] sm:$0xff]  ;;  %v429_v63 = vld [vmem:[%s868_s1 + $0x18] sm:$0xff] }
  0x1b   :  { %275 = vmatpush1.msra.mxu0 %v253_v12  ;;  %v430_v62 = vld [vmem:[%s868_s1 + $0x20] sm:$0xff]  ;;  %v428_v1 = vld [vmem:[%s868_s1 + $0x10] sm:$0xff]  ;;  %v427_v2 = vld [vmem:[%s868_s1 + $0x8] sm:$0xff] }
  0x1c   :  { %276 = vmatprep.subr.mxu0 %v653_v0  ;;  %v426_v3 = vld [vmem:[%s868_s1] sm:$0xff] }
  0x1d   :  { %277 = vmatpush1.msra.mxu0 %v252_v13 }
  0x1e   :  { %278 = vmatprep.subr.mxu0 %v653_v0 }
  0x1f   :  { %279 = vmatpush1.msra.mxu0 %v251_v14 }
  0x20   :  { %280 = vmatprep.subr.mxu0 %v653_v0 }
  0x21   :  { %281 = vmatpush1.msra.mxu0 %v250_v15 }
  0x22   :  { %282 = vmatprep.subr.mxu0 %v653_v0 }
  0x23   :  { %283 = vmatpush1.msra.mxu0 %v249_v16 }
  0x24   :  { %284 = vmatprep.subr.mxu0 %v653_v0 }
  0x25   :  { %285 = vmatpush1.msra.mxu0 %v248_v17 }
  0x26   :  { %286 = vmatprep.subr.mxu0 %v653_v0 }
  0x27   :  { %287 = vmatpush1.msra.mxu0 %v247_v18 }
  0x28   :  { %288 = vmatprep.subr.mxu0 %v653_v0 }
  0x29   :  { %289 = vmatpush1.msra.mxu0 %v246_v19 }
  0x2a   :  { %290 = vmatprep.subr.mxu0 %v653_v0 }
  0x2b   :  { %291 = vmatpush1.msra.mxu0 %v245_v20 }
  0x2c   :  { %292 = vmatprep.subr.mxu0 %v653_v0 }
  0x2d   :  { %293 = vmatpush1.msra.mxu0 %v244_v21 }
  0x2e   :  { %294 = vmatprep.subr.mxu0 %v653_v0 }
  0x2f   :  { %295 = vmatpush1.msra.mxu0 %v243_v22 }
  0x30   :  { %296 = vmatprep.subr.mxu0 %v653_v0 }
  0x31   :  { %297 = vmatpush1.msra.mxu0 %v242_v23 }
  0x32   :  { %298 = vmatprep.subr.mxu0 %v653_v0 }
  0x33   :  { %299 = vmatpush1.msra.mxu0 %v241_v30 }
  0x34   :  { %328 = vmatprep.subr.mxu0 %v653_v0 }
  0x35   :  { %329 = vmatpush2.msra.mxu0 %v258_v31 }
  0x36   :  { %330 = vmatprep.subr.mxu0 %v653_v0 }
  0x37   :  { %331 = vmatpush2.msra.mxu0 %v257_v32 }
  0x9f   :  { %v526_v4 = vpop.xlane.xlu0 %525 }
  0xd0   :  { %v128_v24 = vpop.f32.mrf.mxu0 }
  0xd1   :  { %548 = vmatmul.mubr.msk.f32.vlgmr.msra.gmra.mxu1 %vm142_vm3, %v128_v24 }
  0xd2   :  { %v582_v25 = vpop.f32.mrf.mxu0  ;;  %222 = vmatprep.mubr.f32.mxu1 %v653_v0 }
  0xd4   :  { %v133_v26 = vpop.f32.mrf.mxu0 }
  0xd5   :  { %549 = vmatmul.mubr.msk.f32.gmra.mxu1 %vm142_vm3, %v133_v26 }
  0xd6   :  { %v585_v27 = vpop.f32.mrf.mxu0  ;;  %228 = vmatprep.mubr.f32.mxu1 %v653_v0 }
  0xd8   :  { %v138_v28 = vpop.f32.mrf.mxu0 }
  0xd9   :  { %550 = vmatmul.mubr.msk.f32.gmra.mxu1 %vm142_vm3, %v138_v28 }
  0xda   :  { %v588_v29 = vpop.f32.mrf.mxu0  ;;  %595 = vmatprep.mubr.msk.f32.mxu1 %vm654_vm0, %v653_v0 }
 0x191   :  { %v218_v33 = vpop.f32.mrf.mxu1 }
 0x192   :  { %v235_v38 = vmul.f32 %v218_v33, %v42_v35 }
 0x193   :  { %v220_v36 = vpop.f32.mrf.mxu1 }
 0x194   :  { %v236_v37 = vmul.f32 %v220_v36, %v43_v34 }
 0x195   :  { %v224_v39 = vpop.f32.mrf.mxu1 }
 0x196   :  { %551 = vmatprep.mubr.msk.f32.mxu0 %vm142_vm3, %v236_v37  ;;  %v237_v44 = vmul.f32 %v224_v39, %v44_v41 }
 0x197   :  { %v226_v42 = vpop.f32.mrf.mxu1  ;;  %333 = vmatmul.mubr.f32.vlgmr.msra.gmra.mxu0 %v235_v38 }
 0x198   :  { %v238_v43 = vmul.f32 %v226_v42, %v45_v40 }
 0x199   :  { %v230_v45 = vpop.f32.mrf.mxu1 }
 0x19a   :  { %552 = vmatprep.mubr.msk.f32.mxu0 %vm142_vm3, %v238_v43  ;;  %v239_v50 = vmul.f32 %v230_v45, %v46_v47 }
 0x19b   :  { %v232_v48 = vpop.f32.mrf.mxu1  ;;  %338 = vmatmul.mubr.f32.gmra.mxu0 %v237_v44 }
 0x19c   :  { %v240_v49 = vmul.f32 %v232_v48, %v47_v46 }
 0x19e   :  { %553 = vmatprep.mubr.msk.f32.mxu0 %vm142_vm3, %v240_v49 }
 0x19f   :  { %343 = vmatmul.mubr.f32.gmra.mxu0 %v239_v50 }
 0x257   :  { %v334_v52 = vpop.f32.mrf.mxu0 }
 0x259   :  { %v336_v53 = vpop.f32.mrf.mxu0 }
 0x25b   :  { %v339_v54 = vpop.f32.mrf.mxu0 }
 0x25d   :  { %v341_v55 = vpop.f32.mrf.mxu0 }
 0x25f   :  { %v344_v56 = vpop.f32.mrf.mxu0 }
 0x260   :  { %590 = vmatpush3.msk.msra.mxu1 %vm58_vm1, %v344_v56 }
 0x261   :  { %v346_v57 = vpop.f32.mrf.mxu0  ;;  %591 = vmatprep.subr.mxu1 %v653_v0 }
 0x262   :  { %592 = vmatpush3.msra.mxu1 %v339_v54 }
 0x263   :  { %593 = vmatprep.subr.mxu1 %v653_v0 }
 0x264   :  { %594 = vmatpush3.msra.mxu1 %v334_v52 }
 0x265   :  { %598 = vmatprep.subr.mxu1 %v653_v0  ;;  %596 = vmatmul.mubr.msk.f32.vlgmr.msra.gmra.mxu1 %vm349_vm5, %v348_v58 }
 0x266   :  { %599 = vmatpush3.msra.mxu1 %v433_v59  ;;  %614 = vmatprep.mubr.msk.f32.mxu1 %vm654_vm0, %v653_v0 }
 0x267   :  { %600 = vmatprep.subr.mxu1 %v653_v0 }
 0x268   :  { %601 = vmatpush3.msra.mxu1 %v432_v60 }
 0x269   :  { %602 = vmatprep.subr.mxu1 %v653_v0 }
 0x26a   :  { %603 = vmatpush3.msra.mxu1 %v431_v61 }
 0x26b   :  { %604 = vmatprep.subr.mxu1 %v653_v0 }
 0x26c   :  { %605 = vmatpush3.msra.mxu1 %v430_v62 }
 0x26d   :  { %606 = vmatprep.subr.mxu1 %v653_v0 }
 0x26e   :  { %607 = vmatpush3.msra.mxu1 %v429_v63 }
 0x26f   :  { %608 = vmatprep.subr.mxu1 %v653_v0 }
 0x270   :  { %609 = vmatpush3.msra.mxu1 %v428_v1 }
 0x271   :  { %610 = vmatprep.subr.mxu1 %v653_v0 }
 0x272   :  { %611 = vmatpush3.msra.mxu1 %v427_v2 }
 0x273   :  { %612 = vmatprep.subr.mxu1 %v653_v0 }
 0x274   :  { %613 = vmatpush3.msra.mxu1 %v426_v3 }
 0x275   :  { %615 = vmatmul.mubr.msk.f32.vlgmr.msra.gmra.mxu1 %vm434_vm6, %v334_v52 }
 0x276   :  { %617 = vmatprep.mubr.msk.f32.mxu1 %vm654_vm0, %v653_v0 }
 0x279   :  { %618 = vmatmul.mubr.msk.f32.gmra.mxu1 %vm434_vm6, %v339_v54 }
 0x27a   :  { %620 = vmatprep.mubr.msk.f32.mxu1 %vm654_vm0, %v653_v0 }
 0x27d   :  { %621 = vmatmul.mubr.msk.f32.gmra.mxu1 %vm434_vm6, %v344_v56 }
 0x325   :  { %v422_v5 = vpop.f32.mrf.mxu1 }
 0x326   :  { %532 = vst.msk [vmem:[%s872_s5] sm:$0x3] %vm531_vm7, %v422_v5 }
 0x327   :  { %v597_v6 = vpop.f32.mrf.mxu1  ;;  %534 = vst.msk [vmem:[%s872_s5] sm:$0x3] %vm533_vm8, %v526_v4 }
 0x335   :  { %v509_v7 = vpop.f32.mrf.mxu1 }
 0x336   :  { %535 = vst.msk [vmem:[%s872_s5 + $0x8] sm:$0xff] %vm48_vm2, %v509_v7 }
 0x337   :  { %v616_v0 = vpop.f32.mrf.mxu1 }
 0x339   :  { %v514_v8 = vpop.f32.mrf.mxu1 }
 0x33a   :  { %536 = vst.msk [vmem:[%s872_s5 + $0x10] sm:$0xff] %vm48_vm2, %v514_v8 }
 0x33b   :  { %v619_v9 = vpop.f32.mrf.mxu1 }
 0x33d   :  { %v519_v10 = vpop.f32.mrf.mxu1 }
 0x33e   :  { %538 = vst.msk [vmem:[%s872_s5 + $0x18] sm:$0x3] %vm537_vm9, %v519_v10 }
 0x33f   :  { %v622_v11 = vpop.f32.mrf.mxu1 }
 0x340   :  { %543 = vsyncpa [#allocation3], 1 }

</bundles_post_ra>
